<compile_context>
chip_gen: v7x
topology: tpu7x:2x2x1
jax: 0.10.0
libtpu: 0.0.40
codegen_flags: <defaults>
</compile_context>

<pallas_src>
import functools

import jax
import jax.numpy as jnp
from jax.experimental import pallas as pl
from jax.experimental.pallas import tpu as pltpu


LANE = 128       # lane width: hidden / action dims padded to this
SUBLANE = 8      # sublane granularity for the batch tile
MAX_TB = 1024    # max batch-tile rows


def _round_up(n, m):
    return ((n + m - 1) // m) * m


@functools.lru_cache(maxsize=None)
def _bf16_epilogue_ok():
    """bf16 VALU exists on v6e / v7x; keep the f32 epilogue elsewhere (v5e...)."""
    try:
        kind = jax.devices()[0].device_kind.lower()
    except Exception:
        return False
    return any(tag in kind for tag in ("v6", "v7", "7x"))


def qnetwork_kernel(x_ref, w1_ref, b1_ref, w2_ref, b2_ref, w3_ref, b3_ref,
                    o_ref, *, bf16_epilogue):
    """Fused MLP forward on one batch tile: relu(relu(x@W1+b1)@W2+b2)@W3+b3.

    Matmul operands are bf16 (MXU-native) with f32 accumulation.  The bias-add
    + ReLU epilogue runs in bf16 on chips with bf16 VALUs, f32 otherwise.
    """
    x = x_ref[...].astype(jnp.bfloat16)   # in-kernel cast: free VPU filler

    def layer(h, w_ref, b_ref, relu):
        acc = jnp.dot(h, w_ref[...], preferred_element_type=jnp.float32)
        if bf16_epilogue:
            out = acc.astype(jnp.bfloat16) + b_ref[...].astype(jnp.bfloat16)
        else:
            out = acc + b_ref[...]
        if relu:
            out = jnp.maximum(out, 0.0)
        return out.astype(jnp.bfloat16)

    h1 = layer(x, w1_ref, b1_ref, relu=True)
    h2 = layer(h1, w2_ref, b2_ref, relu=True)
    o_ref[...] = layer(h2, w3_ref, b3_ref, relu=False)


def prepare_qnetwork_params(params):
    """Pad hidden/action dims to 128 lanes and cast weights to bf16.

    Call ONCE (at init / after each optimizer step) — NOT inside the forward
    path.  The K dim of w1 (state size) is intentionally left unpadded so the
    forward can consume unpadded f32 states directly.
    """
    w1, b1 = params["w1"], params["b1"]
    w2, b2 = params["w2"], params["b2"]
    w3, b3 = params["w3"], params["b3"]
    f1, f2, a = w1.shape[1], w2.shape[1], w3.shape[1]
    f1p, f2p, ap = (_round_up(d, LANE) for d in (f1, f2, a))

    def pad_w(w, rows, cols):
        return jnp.pad(w, ((0, rows - w.shape[0]),
                           (0, cols - w.shape[1]))).astype(jnp.bfloat16)

    def pad_b(b, cols):
        return jnp.pad(b, ((0, 0), (0, cols - b.shape[1]))).astype(jnp.float32)

    return {
        "w1": pad_w(w1, w1.shape[0], f1p), "b1": pad_b(b1, f1p),
        "w2": pad_w(w2, f1p, f2p),        "b2": pad_b(b2, f2p),
        "w3": pad_w(w3, f2p, ap),         "b3": pad_b(b3, ap),
    }


@functools.partial(jax.jit, static_argnames=("action_size",))
def qnetwork_forward(x, pparams, *, action_size):
    """Fused QNetwork forward pass as a single batch-tiled Pallas call.

    x:        [B, state_size] float32 (unpadded)
    pparams:  output of prepare_qnetwork_params (padded bf16 weights, f32 bias)
    returns   [B, action_size] float32 action values.
    """
    B, S = x.shape
    w1, b1 = pparams["w1"], pparams["b1"]
    w2, b2 = pparams["w2"], pparams["b2"]
    w3, b3 = pparams["w3"], pparams["b3"]
    F1p, F2p, Ap = w1.shape[1], w2.shape[1], w3.shape[1]

    # Batch tiling: guarantee >= 2 grid steps whenever the batch spans more
    # than one sublane group, so v7x's second TensorCore gets work and DMA /
    # compute overlap exists.  Large batches use up to MAX_TB rows per tile.
    B_aligned = _round_up(B, SUBLANE)
    if B_aligned <= MAX_TB:
        TB = max(SUBLANE, _round_up(B_aligned // 2, SUBLANE))
    else:
        TB = MAX_TB
    Bp = _round_up(B, TB)
    grid = (Bp // TB,)

    # Only pad the batch axis (rare for typical training batch sizes).
    if Bp != B:
        x = jnp.pad(x, ((0, Bp - B), (0, 0)))

    # x block last dim == full array dim -> (8,128) rule satisfied without
    # padding the state dim.  NOTE: if profiling shows exposed x DMA, add
    # pipeline_mode=pl.Buffered(3) here.
    x_spec = pl.BlockSpec((TB, S), lambda i: (i, 0))
    out_spec = pl.BlockSpec((TB, Ap), lambda i: (i, 0))

    def const_spec(arr):
        # Weight / bias blocks never move: constant block index keeps the data
        # VMEM-resident across all batch tiles.
        return pl.BlockSpec(arr.shape, lambda i: (0, 0))

    in_specs = [
        x_spec,
        const_spec(w1), const_spec(b1),
        const_spec(w2), const_spec(b2),
        const_spec(w3), const_spec(b3),
    ]

    flops = 2 * Bp * (S * F1p + F1p * F2p + F2p * Ap)
    bytes_accessed = (
        Bp * S * 4                      # f32 x
        + Bp * Ap * 2                   # bf16 output
        + sum(a.size * a.dtype.itemsize for a in (w1, b1, w2, b2, w3, b3))
    )

    kernel = functools.partial(qnetwork_kernel, bf16_epilogue=_bf16_epilogue_ok())

    out_p = pl.pallas_call(
        kernel,
        out_shape=jax.ShapeDtypeStruct((Bp, Ap), jnp.bfloat16),
        grid=grid,
        in_specs=in_specs,
        out_specs=out_spec,
        compiler_params=pltpu.CompilerParams(
            dimension_semantics=("parallel",),
            vmem_limit_bytes=8 * 1024 * 1024,
        ),
        cost_estimate=pl.CostEstimate(
            flops=flops, transcendentals=0, bytes_accessed=bytes_accessed),
    )(x, w1, b1, w2, b2, w3, b3)

    # Drop batch padding + zero-padded action columns; upcast to f32.
    return out_p[:B, :action_size].astype(jnp.float32)


def init_qnetwork_params(key, state_size, action_size, fc1_units=64, fc2_units=64):
    """Deterministic init mimicking PyTorch nn.Linear default (U(-1/sqrt(fan_in), +))."""
    ks = jax.random.split(key, 6)

    def linear(kw, kb, fan_in, fan_out):
        bound = 1.0 / jnp.sqrt(fan_in)
        # stored [in, out] so the kernel does x @ W
        w = jax.random.uniform(kw, (fan_in, fan_out), jnp.float32, -bound, bound)
        b = jax.random.uniform(kb, (1, fan_out), jnp.float32, -bound, bound)
        return w, b

    w1, b1 = linear(ks[0], ks[1], state_size, fc1_units)
    w2, b2 = linear(ks[2], ks[3], fc1_units, fc2_units)
    w3, b3 = linear(ks[4], ks[5], fc2_units, action_size)
    return {"w1": w1, "b1": b1, "w2": w2, "b2": b2, "w3": w3, "b3": b3}


def _reference_bf16(x, params):
    """Reference emulating the kernel's bf16-operand / f32-accumulate math."""
    def bf(a):
        return a.astype(jnp.bfloat16).astype(jnp.float32)
    h1 = jnp.maximum(bf(x) @ bf(params["w1"]) + params["b1"], 0.0)
    h2 = jnp.maximum(bf(h1) @ bf(params["w2"]) + params["b2"], 0.0)
    return bf(h2) @ bf(params["w3"]) + params["b3"]


def _reference_f32(x, params):
    h1 = jnp.maximum(x @ params["w1"] + params["b1"], 0.0)
    h2 = jnp.maximum(h1 @ params["w2"] + params["b2"], 0.0)
    return h2 @ params["w3"] + params["b3"]


if __name__ == "__main__":
    # Banana-env-like shapes: state 37, 4 actions, two hidden layers of 64.
    state_size, action_size = 37, 4
    key = jax.random.PRNGKey(0)
    k_params, k_x1, k_x2 = jax.random.split(key, 3)

    raw_params = init_qnetwork_params(k_params, state_size, action_size,
                                      fc1_units=64, fc2_units=64)
    # Pad + cast ONCE, outside the forward path.
    pparams = prepare_qnetwork_params(raw_params)

    ok = True
    # Two batches: one sublane-aligned, one that exercises the batch-pad path.
    for kx, batch in ((k_x1, 64), (k_x2, 10)):
        x = jax.random.normal(kx, (batch, state_size), dtype=jnp.float32)
        q_values = jax.block_until_ready(
            qnetwork_forward(x, pparams, action_size=action_size))
        assert q_values.shape == (batch, action_size)

        ref_bf16 = _reference_bf16(x, raw_params)   # kernel's precision recipe
        ref_f32 = _reference_f32(x, raw_params)     # full-precision sanity check
        # bf16 output store / bf16 epilogue add ~0.5% relative error on top of
        # the bf16-weight reference, hence the slightly looser tolerances.
        ok &= bool(jnp.allclose(q_values, ref_bf16, atol=2e-2, rtol=2e-2))
        ok &= bool(jnp.allclose(q_values, ref_f32, atol=5e-2, rtol=5e-2))

    if ok:
        print("KERNEL_OK")
    else:
        print("KERNEL_MISMATCH")
</pallas_src>

<mosaic_0001>
module attributes {stable_mosaic.version = 11 : i64} {
  func.func @qnetwork_kernel(%arg0: i32, %arg1: memref<32x37xf32, #tpu.memory_space<vmem>>, %arg2: memref<37x128xbf16, #tpu.memory_space<vmem>>, %arg3: memref<1x128xf32, #tpu.memory_space<vmem>>, %arg4: memref<128x128xbf16, #tpu.memory_space<vmem>>, %arg5: memref<1x128xf32, #tpu.memory_space<vmem>>, %arg6: memref<128x128xbf16, #tpu.memory_space<vmem>>, %arg7: memref<1x128xf32, #tpu.memory_space<vmem>>, %arg8: memref<32x128xbf16, #tpu.memory_space<vmem>>) attributes {dimension_semantics = [#tpu.dimension_semantics<parallel>], iteration_bounds = array<i64: 2>, scalar_prefetch = 0 : i64, scratch_operands = 0 : i64, tpu.core_type = #tpu.core_type<tc>, window_params = [{transform_indices = @transform_0, window_bounds = array<i64: 32, 37>}, {pipeline_mode = #tpu.pipeline_mode<synchronous>, transform_indices = @transform_1, window_bounds = array<i64: 37, 128>}, {pipeline_mode = #tpu.pipeline_mode<synchronous>, transform_indices = @transform_2, window_bounds = array<i64: 1, 128>}, {pipeline_mode = #tpu.pipeline_mode<synchronous>, transform_indices = @transform_3, window_bounds = array<i64: 128, 128>}, {pipeline_mode = #tpu.pipeline_mode<synchronous>, transform_indices = @transform_4, window_bounds = array<i64: 1, 128>}, {pipeline_mode = #tpu.pipeline_mode<synchronous>, transform_indices = @transform_5, window_bounds = array<i64: 128, 128>}, {pipeline_mode = #tpu.pipeline_mode<synchronous>, transform_indices = @transform_6, window_bounds = array<i64: 1, 128>}, {transform_indices = @transform_7, window_bounds = array<i64: 32, 128>}]} {
    %c0 = arith.constant 0 : index
    %c0_0 = arith.constant 0 : index
    %0 = vector.load %arg1[%c0, %c0_0] : memref<32x37xf32, #tpu.memory_space<vmem>>, vector<32x37xf32>
    %1 = arith.truncf %0 : vector<32x37xf32> to vector<32x37xbf16>
    %c0_1 = arith.constant 0 : index
    %c0_2 = arith.constant 0 : index
    %2 = vector.load %arg2[%c0_1, %c0_2] : memref<37x128xbf16, #tpu.memory_space<vmem>>, vector<37x128xbf16>
    %cst = arith.constant dense<0.000000e+00> : vector<32x128xf32>
    %3 = tpu.matmul %1, %2, %cst {dimension_numbers = #tpu.dot_dimension_numbers<[1], [0], [0], [1], [0, 0, 1, 1], [], []>} : vector<32x37xbf16>, vector<37x128xbf16>, vector<32x128xf32> -> vector<32x128xf32>
    %c0_3 = arith.constant 0 : index
    %c0_4 = arith.constant 0 : index
    %4 = vector.load %arg3[%c0_3, %c0_4] : memref<1x128xf32, #tpu.memory_space<vmem>>, vector<1x128xf32>
    %5 = vector.broadcast %4 : vector<1x128xf32> to vector<32x128xf32>
    %6 = arith.addf %3, %5 : vector<32x128xf32>
    %cst_5 = arith.constant 0.000000e+00 : f32
    %7 = vector.broadcast %cst_5 : f32 to vector<32x128xf32>
    %8 = arith.maximumf %6, %7 : vector<32x128xf32>
    %9 = arith.truncf %8 : vector<32x128xf32> to vector<32x128xbf16>
    %c0_6 = arith.constant 0 : index
    %c0_7 = arith.constant 0 : index
    %10 = vector.load %arg4[%c0_6, %c0_7] : memref<128x128xbf16, #tpu.memory_space<vmem>>, vector<128x128xbf16>
    %cst_8 = arith.constant dense<0.000000e+00> : vector<32x128xf32>
    %11 = tpu.matmul %9, %10, %cst_8 {dimension_numbers = #tpu.dot_dimension_numbers<[1], [0], [0], [1], [0, 0, 1, 1], [], []>} : vector<32x128xbf16>, vector<128x128xbf16>, vector<32x128xf32> -> vector<32x128xf32>
    %c0_9 = arith.constant 0 : index
    %c0_10 = arith.constant 0 : index
    %12 = vector.load %arg5[%c0_9, %c0_10] : memref<1x128xf32, #tpu.memory_space<vmem>>, vector<1x128xf32>
    %13 = vector.broadcast %12 : vector<1x128xf32> to vector<32x128xf32>
    %14 = arith.addf %11, %13 : vector<32x128xf32>
    %cst_11 = arith.constant 0.000000e+00 : f32
    %15 = vector.broadcast %cst_11 : f32 to vector<32x128xf32>
    %16 = arith.maximumf %14, %15 : vector<32x128xf32>
    %17 = arith.truncf %16 : vector<32x128xf32> to vector<32x128xbf16>
    %c0_12 = arith.constant 0 : index
    %c0_13 = arith.constant 0 : index
    %18 = vector.load %arg6[%c0_12, %c0_13] : memref<128x128xbf16, #tpu.memory_space<vmem>>, vector<128x128xbf16>
    %cst_14 = arith.constant dense<0.000000e+00> : vector<32x128xf32>
    %19 = tpu.matmul %17, %18, %cst_14 {dimension_numbers = #tpu.dot_dimension_numbers<[1], [0], [0], [1], [0, 0, 1, 1], [], []>} : vector<32x128xbf16>, vector<128x128xbf16>, vector<32x128xf32> -> vector<32x128xf32>
    %c0_15 = arith.constant 0 : index
    %c0_16 = arith.constant 0 : index
    %20 = vector.load %arg7[%c0_15, %c0_16] : memref<1x128xf32, #tpu.memory_space<vmem>>, vector<1x128xf32>
    %21 = vector.broadcast %20 : vector<1x128xf32> to vector<32x128xf32>
    %22 = arith.addf %19, %21 : vector<32x128xf32>
    %23 = arith.truncf %22 : vector<32x128xf32> to vector<32x128xbf16>
    %c0_17 = arith.constant 0 : index
    %c0_18 = arith.constant 0 : index
    %24 = vector.load %arg8[%c0_17, %c0_18] : memref<32x128xbf16, #tpu.memory_space<vmem>>, vector<32x128xbf16>
    tpu.vector_store %arg8[%c0_17, %c0_18], %23 {strides = array<i32>} : memref<32x128xbf16, #tpu.memory_space<vmem>>, vector<32x128xbf16>,
    return
  }
  func.func @transform_0(%arg0: i32) -> (i32, i32) {
    %c0_i32 = arith.constant 0 : i32
    %c0_i32_0 = arith.constant 0 : i32
    return %arg0, %c0_i32 : i32, i32
  }
  func.func @transform_1(%arg0: i32) -> (i32, i32) {
    %c0_i32 = arith.constant 0 : i32
    %c0_i32_0 = arith.constant 0 : i32
    %c0_i32_1 = arith.constant 0 : i32
    return %c0_i32, %c0_i32_0 : i32, i32
  }
  func.func @transform_2(%arg0: i32) -> (i32, i32) {
    %c0_i32 = arith.constant 0 : i32
    %c0_i32_0 = arith.constant 0 : i32
    %c0_i32_1 = arith.constant 0 : i32
    return %c0_i32, %c0_i32_0 : i32, i32
  }
  func.func @transform_3(%arg0: i32) -> (i32, i32) {
    %c0_i32 = arith.constant 0 : i32
    %c0_i32_0 = arith.constant 0 : i32
    %c0_i32_1 = arith.constant 0 : i32
    return %c0_i32, %c0_i32_0 : i32, i32
  }
  func.func @transform_4(%arg0: i32) -> (i32, i32) {
    %c0_i32 = arith.constant 0 : i32
    %c0_i32_0 = arith.constant 0 : i32
    %c0_i32_1 = arith.constant 0 : i32
    return %c0_i32, %c0_i32_0 : i32, i32
  }
  func.func @transform_5(%arg0: i32) -> (i32, i32) {
    %c0_i32 = arith.constant 0 : i32
    %c0_i32_0 = arith.constant 0 : i32
    %c0_i32_1 = arith.constant 0 : i32
    return %c0_i32, %c0_i32_0 : i32, i32
  }
  func.func @transform_6(%arg0: i32) -> (i32, i32) {
    %c0_i32 = arith.constant 0 : i32
    %c0_i32_0 = arith.constant 0 : i32
    %c0_i32_1 = arith.constant 0 : i32
    return %c0_i32, %c0_i32_0 : i32, i32
  }
  func.func @transform_7(%arg0: i32) -> (i32, i32) {
    %c0_i32 = arith.constant 0 : i32
    %c0_i32_0 = arith.constant 0 : i32
    return %arg0, %c0_i32 : i32, i32
  }
}

</mosaic_0001>

<bundles_post_ra>
// kernel: qnetwork_forward.1
= control target key start
LH: loop header
LB: loop body
LE: loop exit
PB: predicated region body
PF: predicated region fallthrough
CT: control target
= control target key end

     0   :  { %12 = vsyncpa [#allocation3], 0  ;;  %s990_s24 = smov 0   ;;  %s1097_s0 = inlined_call_operand.vmem [shape: f32[64,37], index: 0, kind: input, shape index: {}]   ;;  %s1098_s1 = inlined_call_operand.vmem [shape: bf16[37,128], index: 1, kind: input, shape index: {}]   ;;  %s1099_s2 = inlined_call_operand.vmem [shape: f32[1,128], index: 2, kind: input, shape index: {}]   ;;  %s1100_s3 = inlined_call_operand.vmem [shape: bf16[128,128], index: 3, kind: input, shape index: {}]   ;;  %s1101_s4 = inlined_call_operand.vmem [shape: f32[1,128], index: 4, kind: input, shape index: {}]   ;;  %s1102_s5 = inlined_call_operand.hbm [shape: bf16[128,128], index: 5, kind: input, shape index: {}]   ;;  %s1103_s6 = inlined_call_operand.vmem [shape: f32[1,128], index: 6, kind: input, shape index: {}]   ;;  %s1104_s7 = inlined_call_operand.vmem [shape: bf16[64,128], index: 7, kind: output, shape index: {}]  }
   0x1 LB: > { %s734_s25 = sadd.s32 4294967295, %s944_s24   ;;  %p736_p0 = scmp.ge.s32.totalorder %s944_s24, 1  ;;  %s944_s24 = sphi %s990_s24, %s18_s24  }
   0x2   : > { %p201_p1 = scmp.lt.s32.totalorder %s944_s24, 3  ;;  %s946_s26 = smov [#allocation2]  }
   0x3   : > { %s225_s27 = sshll.u32 %s946_s26, 4  ;;  %p1004_p3 = scmp.eq.s32.totalorder %s734_s25, 0  ;;  %s226_s27 = int_to_ptr.vmem [resolvable:$true] %s225_s27 }
   0x4   : > { %p998_p2 = pnand %p736_p0, %p201_p1  ;;  %s906_s10 = scalar_lea.hbm %s1102_s5, 1024 }
   0x5   : > { %s1109_s29 = scalar_select %p1004_p3, 1, 0 }
   0x6   : > { %s1108_s28 = scalar_select %p998_p2, 1, 0 }
   0x7   : > { %p869_p4 = pneg %p998_p2  ;;  %p907_p6 = scmp.ne.s32.totalorder %s1102_s5, %s906_s10 }
   0x8   : > { %p913_p10 = scmp.lt.u32.totalorder %s906_s10, %s1102_s5 }
   0x9   : > { %p1012_p5 = pnand %p1004_p3, %p869_p4 }
   0xb   : > { %p908_p7 = pneg %p1012_p5 }
   0xd   : > { %p909_p8 = pnand %p908_p7, %p907_p6 }
   0xf   : > { %p910_p9 = pneg %p909_p8 }
  0x11   : > { %p915_p11 = pnand %p913_p10, %p910_p9 }
  0x13   : > { %918 = shalt.err (!%p915_p11)
}
  0x14   : > { %s919_s15 = scalar_lea.vmem %s226_s27, 1024  ;;  %p927_p1 = scmp.lt.s32.totalorder %s226_s27, %s226_s27 }
  0x15   : > { %p920_p12 = scmp.ne.s32.totalorder %s226_s27, %s919_s15  ;;  %p928_p4 = scmp.lt.s32.totalorder %s919_s15, %s919_s15 }
  0x17   : > { %p922_p13 = pnand %p920_p12, %p908_p7  ;;  %p929_p3 = por %p928_p4, %p927_p1 }
  0x19   : > { %p923_p0 = pneg %p922_p13 }
  0x1b   : > { %p930_p2 = pnand %p929_p3, %p923_p0 }
  0x1d   : > { %933 = shalt.err (!%p930_p2)
}
  0x1e   : > { %s947_s16 = smov 64   ;;  %s948_s17 = smov 4  }
  0x1f   : > { %872 = dma.hbm_to_vmem [thread:$0]  (!%p1012_p5), %s1102_s5, 1024, %s226_s27, [#allocation3], %s947_s16, %s947_s16, %s948_s17  }
  0x20   : > { %p1111_p6 = scmp.ne.s32.totalorder %s1108_s28, 0 }
  0x21   : > { %p1112_p8 = scmp.ne.s32.totalorder (!%p1111_p6), %s1109_s29, 0 }
  0x22   : > { %253 = sbr.rel (%p1111_p6) target bundleno = 720 (0x2d0), region = 48 }
  0x29   : > { %939 = dma.done.wait (%p1112_p8), [#allocation3], 1024  }
  0x2a   : > { %941 = vsyncadd (%p1112_p8), [#allocation3], 4294966272  ;;  %s741_s20 = sshll.u32 %s734_s25, 2  ;;  %vm338_vm0 = vcmask 1041408   ;;  %vm339_vm1 = vcmask 1042432   ;;  %v949_v0 = vmov 65535  }
  0x2b   : > { %p286_p2 = scmp.lt.s32.totalorder %s741_s20, 7  ;;  %v340_v1 = vsel %vm338_vm0, 4294967295, %v949_v0  ;;  %v887_v2 = vld [vmem:[%s1098_s1] sm:$0xff]   ;;  %v888_v3 = vld [vmem:[%s1098_s1 + $0x8] sm:$0xff]   ;;  %vm331_vm2 = vcmask 302080   ;;  %v892_v14 = vld [vmem:[%s1100_s3 + $0x10] sm:$0xff]  }
  0x2c   : > { %v341_v4 = vsel %vm339_vm1, %v340_v1, 0  ;;  %815 = vmatprep.subr.bf16.mxu0 %v887_v2  ;;  %v889_v5 = vld [vmem:[%s1098_s1 + $0x10] ss:$0 sps:$4 sm:$0x77]   ;;  %v890_v10 = vld [vmem:[%s1100_s3] sm:$0xff]   ;;  %v891_v11 = vld [vmem:[%s1100_s3 + $0x8] sm:$0xff]  }
  0x2d   : > { %s1114_s20 = smov (!%p286_p2, %s741_s20), 7  ;;  %816 = vmatpush3.bf16.msra.mxu0 %v887_v2  ;;  %v343_v8 = vand.u32 %v889_v5, %v341_v4  ;;  %825 = vmatprep.subr.bf16.mxu1 %v890_v10  ;;  %v893_v16 = vld [vmem:[%s1100_s3 + $0x18] sm:$0xff]   ;;  %v894_v17 = vld [vmem:[%s1100_s3 + $0x20] sm:$0xff]   ;;  %v895_v18 = vld [vmem:[%s1100_s3 + $0x28] sm:$0xff]  }
  0x2e   : > { %s742_s21 = sshll.u32 %s1114_s20, 3  ;;  %817 = vmatprep.subr.bf16.mxu0 %v888_v3  ;;  %826 = vmatpush3.bf16.msra.mxu1 %v890_v10  ;;  %v896_v19 = vld [vmem:[%s1100_s3 + $0x30] sm:$0xff]   ;;  %v897_v20 = vld [vmem:[%s1100_s3 + $0x38] sm:$0xff]   ;;  %v898_v21 = vld [vmem:[#allocation2] sm:$0xff]   ;;  %s744_s10 = sshll.u32 %s1114_s20, 2 }
  0x2f   : > { %s289_s26 = scalar_lea.vmem %s1097_s0, %s742_s21  ;;  %827 = vmatprep.subr.bf16.mxu1 %v891_v11  ;;  %v899_v22 = vld [vmem:[#allocation2 + $0x8] sm:$0xff]   ;;  %v900_v23 = vld [vmem:[#allocation2 + $0x10] sm:$0xff]   ;;  %v901_v24 = vld [vmem:[#allocation2 + $0x18] sm:$0xff]   ;;  %s295_s13 = scalar_lea.vmem %s1104_s7, %s744_s10 }
  0x30   : > { %v298_v6 = vld [vmem:[%s289_s26] sm:$0xff]  ;;  %v299_v7 = vld [vmem:[%s289_s26 + $0x8] sm:$0xff]  ;;  %v300_v12 = vld [vmem:[%s289_s26 + $0x10] sm:$0xff] }
  0x31   : > { %v302_v9 = vpack.c.bf16 %v299_v7, %v298_v6  ;;  %818 = vmatpush3.bf16.msra.mxu0 %v888_v3  ;;  %v301_v13 = vld [vmem:[%s289_s26 + $0x18] sm:$0xff]  ;;  %v902_v25 = vld [vmem:[#allocation2 + $0x20] sm:$0xff]   ;;  %v903_v26 = vld [vmem:[#allocation2 + $0x28] sm:$0xff]  }
  0x32   : > { %819 = vmatprep.subr.bf16.mxu0 %v343_v8  ;;  %v303_v15 = vpack.c.bf16 %v301_v13, %v300_v12  ;;  %828 = vmatpush3.bf16.msra.mxu1 %v891_v11  ;;  %v745_v27 = vld [vmem:[%s1099_s2] ss:$0 sm:$0xff]  ;;  %v904_v42 = vld [vmem:[#allocation2 + $0x30] sm:$0xff]   ;;  %v905_v43 = vld [vmem:[#allocation2 + $0x38] sm:$0xff]  }
  0x33   : > { %821 = vmatprep.mubr.msk.bf16.mxu0 %vm331_vm2, %v302_v9  ;;  %829 = vmatprep.subr.bf16.mxu1 %v892_v14  ;;  %v751_v44 = vld [vmem:[%s1101_s4] ss:$0 sm:$0xff] }
  0x34   : > { %v760_v60 = vld [vmem:[%s1103_s6] ss:$0 sm:$0xff] }
  0x35   : > { %820 = vmatpush3.bf16.msra.mxu0 %v343_v8 }
  0x36   : > { %830 = vmatpush3.bf16.msra.mxu1 %v892_v14  ;;  %845 = vmatprep.subr.bf16.mxu0 %v898_v21 }
  0x37   : > { %831 = vmatprep.subr.bf16.mxu1 %v893_v16 }
  0x38   : > { %822 = vmatmul.mubr.msk.bf16.vlgmr.msra.gmra.mrb[0].mxu0 %vm331_vm2, %v303_v15 }
  0x39   : > { %846 = vmatpush3.bf16.msra.mxu0 %v898_v21 }
  0x3a   : > { %832 = vmatpush3.bf16.msra.mxu1 %v893_v16  ;;  %847 = vmatprep.subr.bf16.mxu0 %v899_v22 }
  0x3b   : > { %833 = vmatprep.subr.bf16.mxu1 %v894_v17 }
  0x3d   : > { %848 = vmatpush3.bf16.msra.mxu0 %v899_v22 }
  0x3e   : > { %834 = vmatpush3.bf16.msra.mxu1 %v894_v17  ;;  %849 = vmatprep.subr.bf16.mxu0 %v900_v23 }
  0x3f   : > { %835 = vmatprep.subr.bf16.mxu1 %v895_v18 }
  0x41   : > { %850 = vmatpush3.bf16.msra.mxu0 %v900_v23 }
  0x42   : > { %836 = vmatpush3.bf16.msra.mxu1 %v895_v18  ;;  %851 = vmatprep.subr.bf16.mxu0 %v901_v24 }
  0x43   : > { %837 = vmatprep.subr.bf16.mxu1 %v896_v19 }
  0x45   : > { %852 = vmatpush3.bf16.msra.mxu0 %v901_v24 }
  0x46   : > { %838 = vmatpush3.bf16.msra.mxu1 %v896_v19  ;;  %853 = vmatprep.subr.bf16.mxu0 %v902_v25 }
  0x47   : > { %839 = vmatprep.subr.bf16.mxu1 %v897_v20 }
  0x49   : > { %854 = vmatpush3.bf16.msra.mxu0 %v902_v25 }
  0x4a   : > { %840 = vmatpush3.bf16.msra.mxu1 %v897_v20  ;;  %855 = vmatprep.subr.bf16.mxu0 %v903_v26 }
  0x4d   : > { %856 = vmatpush3.bf16.msra.mxu0 %v903_v26 }
  0x4e   : > { %857 = vmatprep.subr.bf16.mxu0 %v904_v42 }
  0x51   : > { %858 = vmatpush3.bf16.msra.mxu0 %v904_v42 }
  0x52   : > { %859 = vmatprep.subr.bf16.mxu0 %v905_v43 }
  0x55   : > { %860 = vmatpush3.bf16.msra.mxu0 %v905_v43 }
 0x10b   : > { %v823_v28 = vpop.f32.mrb[0].mxu0 }
 0x10c   : > { %v388_v29 = vadd.f32 %v823_v28, %v745_v27  ;;  %v379_v30 = vpop.f32.mrb[1].mxu0 }
 0x10d   : > { %v380_v31 = vadd.f32 %v745_v27, %v379_v30  ;;  %v824_v32 = vpop.f32.mrb[2].mxu0 }
 0x10e   : > { %v391_v33 = vadd.f32 %v824_v32, %v745_v27  ;;  %v382_v34 = vpop.f32.mrb[3].mxu0  ;;  %v396_v36 = vmax.f32 %v388_v29, 0.0 }
 0x10f   : > { %v383_v35 = vadd.f32 %v745_v27, %v382_v34  ;;  %v394_v38 = vmax.f32 %v380_v31, 0.0 }
 0x110   : > { %v397_v37 = vmax.f32 %v391_v33, 0.0 }
 0x111   : > { %v395_v39 = vmax.f32 %v383_v35, 0.0 }
 0x112   : > { %v399_v40 = vpack.c.bf16 %v397_v37, %v396_v36 }
 0x113   : > { %v398_v41 = vpack.c.bf16 %v395_v39, %v394_v38 }
 0x115   : > { %841 = vmatprep.mubr.bf16.mxu1 %v398_v41 }
 0x116   : > { %842 = vmatmul.mubr.bf16.vlgmr.msra.gmra.mrb[0].mxu1 %v399_v40 }
 0x1e9   : > { %v843_v45 = vpop.f32.mrb[0].mxu1 }
 0x1ea   : > { %v514_v46 = vadd.f32 %v843_v45, %v751_v44  ;;  %v505_v47 = vpop.f32.mrb[1].mxu1 }
 0x1eb   : > { %v506_v48 = vadd.f32 %v751_v44, %v505_v47  ;;  %v844_v49 = vpop.f32.mrb[2].mxu1 }
 0x1ec   : > { %v517_v50 = vadd.f32 %v844_v49, %v751_v44  ;;  %v508_v51 = vpop.f32.mrb[3].mxu1  ;;  %v522_v53 = vmax.f32 %v514_v46, 0.0 }
 0x1ed   : > { %v509_v52 = vadd.f32 %v751_v44, %v508_v51  ;;  %v520_v55 = vmax.f32 %v506_v48, 0.0 }
 0x1ee   : > { %v523_v54 = vmax.f32 %v517_v50, 0.0 }
 0x1ef   : > { %v521_v56 = vmax.f32 %v509_v52, 0.0 }
 0x1f0   : > { %v525_v57 = vpack.c.bf16 %v523_v54, %v522_v53 }
 0x1f1   : > { %v524_v58 = vpack.c.bf16 %v521_v56, %v520_v55 }
 0x1f3   : > { %861 = vmatprep.mubr.bf16.mxu0 %v524_v58 }
 0x1f4   : > { %862 = vmatmul.mubr.bf16.vlgmr.msra.gmra.mrb[4].mxu0 %v525_v57 }
 0x2c7   : > { %v863_v59 = vpop.f32.mrb[4].mxu0 }
 0x2c8   : > { %v631_v61 = vpop.f32.mrb[5].mxu0  ;;  %v640_v63 = vadd.f32 %v863_v59, %v760_v60 }
 0x2c9   : > { %v864_v62 = vpop.f32.mrb[6].mxu0  ;;  %v632_v2 = vadd.f32 %v760_v60, %v631_v61 }
 0x2ca   : > { %v643_v0 = vadd.f32 %v864_v62, %v760_v60  ;;  %v634_v1 = vpop.f32.mrb[7].mxu0 }
 0x2cb   : > { %v635_v3 = vadd.f32 %v760_v60, %v634_v1 }
 0x2cc   : > { %v787_v4 = vpack.c.bf16 %v643_v0, %v640_v63 }
 0x2cd   : > { %v782_v5 = vpack.c.bf16 %v635_v3, %v632_v2 }
 0x2ce   : > { %789 = vst [vmem:[%s295_s13 + $0x8] sm:$0xff] %v787_v4  }
 0x2cf   : > { %783 = vst [vmem:[%s295_s13] sm:$0xff] %v782_v5  }
 0x2d0 PF: > { %s18_s24 = sadd.s32 1, %s944_s24  }
 0x2d1   : > { %p15_p3 = scmp.ge.s32.totalorder %s18_s24, 4  }
 0x2d3   :  { %17 = sbr.rel (!%p15_p3) target bundleno = 1 (0x1), region = 83 }
 0x2da   :  { %688 = vsyncpa [#allocation3], 1 }
 0x2db   :  { %690 = vsyncpa [#allocation3 + $0x1], 1 }

</bundles_post_ra>
